<compile_context>
chip_gen: v5e
topology: v5e:2x2
jax: 0.10.0
libtpu: 0.0.40
codegen_flags: <defaults>
</compile_context>

<pallas_src>
import functools

import jax
import jax.numpy as jnp
from jax import lax
from jax.experimental import pallas as pl
from jax.experimental.pallas import tpu as pltpu


def cross_attention_kernel(q_ref, k_ref, v_ref,
                           wq_ref, bq_ref,
                           wk_ref, bk_ref,
                           wv_ref, bv_ref,
                           o_ref,
                           kproj_ref, vproj_ref,
                           *, compute_dtype, approx_recip):
    BT, TQ, E = q_ref.shape
    Lk = k_ref.shape[1]
    cd = compute_dtype

    # ---- K/V projections: only on the FIRST q step of each batch tile ------
    # (q axis is "arbitrary" -> sequential per core, so the scratch cache is
    #  valid for all subsequent q tiles of this batch tile.)
    @pl.when(pl.program_id(1) == 0)
    def _():
        k2 = k_ref[...].reshape(BT * Lk, E).astype(cd)
        v2 = v_ref[...].reshape(BT * Lk, E).astype(cd)
        K = (jnp.dot(k2, wk_ref[...], preferred_element_type=jnp.float32)
             + bk_ref[...])
        V = (jnp.dot(v2, wv_ref[...], preferred_element_type=jnp.float32)
             + bv_ref[...])
        kproj_ref[...] = K.reshape(BT, Lk, E).astype(cd)
        vproj_ref[...] = V.reshape(BT, Lk, E).astype(cd)

    # ---- Q projection (1/sqrt(E) already folded into wq/bq in the wrapper) -
    q2 = q_ref[...].reshape(BT * TQ, E).astype(cd)
    Q = (jnp.dot(q2, wq_ref[...], preferred_element_type=jnp.float32)
         + bq_ref[...]).reshape(BT, TQ, E)

    # ---- Scores: contract on E of both operands (no K transpose) -----------
    scores = lax.dot_general(
        Q.astype(cd), kproj_ref[...],
        dimension_numbers=(((2,), (2,)), ((0,), (0,))),
        preferred_element_type=jnp.float32)                     # (BT, TQ, Lk)

    # ---- Softmax (f32 elementwise math; v5e VPU/EUP have no bf16) ----------
    m = jnp.max(scores, axis=-1, keepdims=True)
    e = jnp.exp(scores - m)
    denom = jnp.sum(e, axis=-1, keepdims=True)
    weights = e * pl.reciprocal(denom, approx=approx_recip)

    # ---- Attention output: (BT,TQ,Lk) @ (BT,Lk,E) -> (BT,TQ,E) -------------
    out = lax.dot_general(
        weights.astype(cd), vproj_ref[...],
        dimension_numbers=(((2,), (1,)), ((0,), (0,))),
        preferred_element_type=jnp.float32)
    o_ref[...] = out.astype(o_ref.dtype)


def _round_up(x, m):
    return (x + m - 1) // m * m


def _choose_q_tiling(lq, target):
    """Return (TQ, Lq_padded).  TQ divides Lq_padded and is a multiple of 8
    (or equals the full, un-padded Lq when Lq <= target)."""
    if lq <= target:
        return lq, lq                       # single full tile; always legal
    for t in range(target, 7, -1):          # clean divisor, multiple of 8
        if lq % t == 0 and t % 8 == 0:
            return t, lq
    t = max(8, target - target % 8)         # awkward Lq: pad instead of a huge block
    return t, _round_up(lq, t)


def _pick_b_tile(b, rows_target, tq):
    """Largest divisor of b giving roughly rows_target projection rows."""
    want = max(1, rows_target // max(tq, 1))
    for t in range(min(b, want), 0, -1):
        if b % t == 0:
            return t
    return 1


def _vmem_limit_bytes():
    """Generation-aware scoped-VMEM limit with headroom for Mosaic scratch."""
    cap = 128 * 1024 * 1024
    try:
        info = pltpu.get_tpu_info()
        cap = int(getattr(info, "vmem_capacity_bytes", cap) or cap)
    except Exception:
        pass
    # ~38 MiB on v7x (64 MiB physical), ~76 MiB on v5e/v6e (128 MiB physical).
    return min(int(cap * 0.6), 96 * 1024 * 1024)


def cross_attention(query, key, value, wq, bq, wk, bk, wv, bv,
                    *, compute_dtype=None, q_tile=256, proj_rows=256):
    B, Lq, E = query.shape
    _, Lk, _ = key.shape
    inv_scale = 1.0 / (float(E) ** 0.5)

    # On v5e the MXU is bf16-native: pass compute_dtype=jnp.bfloat16 there
    # (accumulation + softmax stay f32 regardless).
    cd = jnp.dtype(compute_dtype) if compute_dtype is not None else query.dtype
    approx_recip = bool(cd == jnp.bfloat16)   # exact recip on the f32 path

    TQ, Lq_pad = _choose_q_tiling(Lq, q_tile)
    BT = _pick_b_tile(B, proj_rows, TQ)
    n_b, n_q = B // BT, Lq_pad // TQ

    if Lq_pad != Lq:
        query = jnp.pad(query, ((0, 0), (0, Lq_pad - Lq), (0, 0)))

    # Fold the 1/sqrt(E) scale into the query projection; cast weights to the
    # compute dtype once here (not per grid step in the kernel).
    wq_c = (wq * inv_scale).astype(cd)
    wk_c = wk.astype(cd)
    wv_c = wv.astype(cd)
    bq2 = (bq * inv_scale).reshape(1, E).astype(jnp.float32)
    bk2 = bk.reshape(1, E).astype(jnp.float32)
    bv2 = bv.reshape(1, E).astype(jnp.float32)

    kernel = functools.partial(cross_attention_kernel,
                               compute_dtype=cd,
                               approx_recip=approx_recip)

    q_spec = pl.BlockSpec((BT, TQ, E), lambda bi, qi: (bi, qi, 0))
    # K/V / weight / bias block indices are constant across the q axis, so
    # Pallas does not re-DMA them between q steps.
    kv_spec = pl.BlockSpec((BT, Lk, E), lambda bi, qi: (bi, 0, 0))
    w_spec = pl.BlockSpec((E, E), lambda bi, qi: (0, 0))
    b_spec = pl.BlockSpec((1, E), lambda bi, qi: (0, 0))
    out_spec = pl.BlockSpec((BT, TQ, E), lambda bi, qi: (bi, qi, 0))

    itemsize = jnp.dtype(query.dtype).itemsize
    # Projections counted once per batch element (K/V cached across q tiles).
    flops = (2 * B * E * E * (Lq_pad + 2 * Lk)      # Q/K/V projections
             + 4 * B * Lq_pad * Lk * E)             # scores + attn@V
    bytes_accessed = (itemsize * (B * Lq_pad * E + 2 * B * Lk * E)   # q,k,v in
                      + jnp.dtype(cd).itemsize * 3 * E * E           # weights
                      + 4 * 3 * E                                    # biases
                      + itemsize * B * Lq_pad * E)                   # output

    # NOTE(v7x): with the K/V cache the q axis is "arbitrary"; if n_b < 2 only
    # one TensorCore gets work.  Use a batch tile split (BT < B) when possible.
    out = pl.pallas_call(
        kernel,
        out_shape=jax.ShapeDtypeStruct((B, Lq_pad, E), query.dtype),
        grid_spec=pltpu.PrefetchScalarGridSpec(
            num_scalar_prefetch=0,
            grid=(n_b, n_q),
            in_specs=[
                q_spec,                # query
                kv_spec,               # key
                kv_spec,               # value
                w_spec, b_spec,        # Wq (scaled), bq (scaled)
                w_spec, b_spec,        # Wk, bk
                w_spec, b_spec,        # Wv, bv
            ],
            out_specs=out_spec,
            scratch_shapes=[
                pltpu.VMEM((BT, Lk, E), cd),   # cached projected K
                pltpu.VMEM((BT, Lk, E), cd),   # cached projected V
            ],
        ),
        compiler_params=pltpu.CompilerParams(
            dimension_semantics=("parallel", "arbitrary"),
            vmem_limit_bytes=_vmem_limit_bytes()),
        cost_estimate=pl.CostEstimate(
            flops=int(flops),
            transcendentals=int(B * Lq_pad * Lk),
            bytes_accessed=int(bytes_accessed)),
    )(query, key, value, wq_c, bq2, wk_c, bk2, wv_c, bv2)

    if Lq_pad != Lq:
        out = out[:, :Lq]
    return out


def reference(query, key, value, wq, bq, wk, bk, wv, bv):
    E = query.shape[-1]
    Q = query @ wq + bq
    K = key @ wk + bk
    V = value @ wv + bv
    scores = jnp.einsum("bqe,bke->bqk", Q, K) / (E ** 0.5)
    w = jax.nn.softmax(scores, axis=-1)
    return jnp.einsum("bqk,bke->bqe", w, V)


if __name__ == "__main__":
    key0 = jax.random.PRNGKey(0)
    B, Lq, Lk, E = 2, 8, 8, 32

    ks = jax.random.split(key0, 9)
    query = jax.random.normal(ks[0], (B, Lq, E), jnp.float32)
    key_t = jax.random.normal(ks[1], (B, Lk, E), jnp.float32)
    value = jax.random.normal(ks[2], (B, Lk, E), jnp.float32)

    # Linear layers: [E, E] weight (stored for x @ W) + [E] bias.
    lim = 1.0 / (E ** 0.5)
    wq = jax.random.uniform(ks[3], (E, E), jnp.float32, -lim, lim)
    bq = jax.random.uniform(ks[4], (E,), jnp.float32, -lim, lim)
    wk = jax.random.uniform(ks[5], (E, E), jnp.float32, -lim, lim)
    bk = jax.random.uniform(ks[6], (E,), jnp.float32, -lim, lim)
    wv = jax.random.uniform(ks[7], (E, E), jnp.float32, -lim, lim)
    bv = jax.random.uniform(ks[8], (E,), jnp.float32, -lim, lim)

    ref = reference(query, key_t, value, wq, bq, wk, bk, wv, bv)

    # f32 path (exact semantics of the PyTorch module).
    out = cross_attention(query, key_t, value, wq, bq, wk, bk, wv, bv)
    out = jax.block_until_ready(out)
    assert out.shape == (B, Lq, E)
    assert jnp.allclose(out, ref, atol=1e-4, rtol=1e-4)

    # bf16 MXU-operand fast path (recommended default on v5e); accumulation
    # and softmax math stay f32.
    out_bf16 = cross_attention(query, key_t, value, wq, bq, wk, bk, wv, bv,
                               compute_dtype=jnp.bfloat16)
    out_bf16 = jax.block_until_ready(out_bf16)
    assert jnp.allclose(out_bf16, ref, atol=5e-2, rtol=5e-2)

    print("KERNEL_OK")
</pallas_src>

<mosaic_0001>
module attributes {stable_mosaic.version = 11 : i64} {
  func.func @cross_attention_kernel(%arg0: i32, %arg1: i32, %arg2: memref<2x8x32xf32, #tpu.memory_space<vmem>>, %arg3: memref<2x8x32xf32, #tpu.memory_space<vmem>>, %arg4: memref<2x8x32xf32, #tpu.memory_space<vmem>>, %arg5: memref<32x32xf32, #tpu.memory_space<vmem>>, %arg6: memref<1x32xf32, #tpu.memory_space<vmem>>, %arg7: memref<32x32xf32, #tpu.memory_space<vmem>>, %arg8: memref<1x32xf32, #tpu.memory_space<vmem>>, %arg9: memref<32x32xf32, #tpu.memory_space<vmem>>, %arg10: memref<1x32xf32, #tpu.memory_space<vmem>>, %arg11: memref<2x8x32xf32, #tpu.memory_space<vmem>>, %arg12: memref<2x8x32xf32, #tpu.memory_space<vmem>>, %arg13: memref<2x8x32xf32, #tpu.memory_space<vmem>>) attributes {dimension_semantics = [#tpu.dimension_semantics<parallel>, #tpu.dimension_semantics<arbitrary>], iteration_bounds = array<i64: 1, 1>, scalar_prefetch = 0 : i64, scratch_operands = 2 : i64, tpu.core_type = #tpu.core_type<tc>, window_params = [{transform_indices = @transform_0, window_bounds = array<i64: 2, 8, 32>}, {transform_indices = @transform_1, window_bounds = array<i64: 2, 8, 32>}, {transform_indices = @transform_2, window_bounds = array<i64: 2, 8, 32>}, {pipeline_mode = #tpu.pipeline_mode<synchronous>, transform_indices = @transform_3, window_bounds = array<i64: 32, 32>}, {pipeline_mode = #tpu.pipeline_mode<synchronous>, transform_indices = @transform_4, window_bounds = array<i64: 1, 32>}, {pipeline_mode = #tpu.pipeline_mode<synchronous>, transform_indices = @transform_5, window_bounds = array<i64: 32, 32>}, {pipeline_mode = #tpu.pipeline_mode<synchronous>, transform_indices = @transform_6, window_bounds = array<i64: 1, 32>}, {pipeline_mode = #tpu.pipeline_mode<synchronous>, transform_indices = @transform_7, window_bounds = array<i64: 32, 32>}, {pipeline_mode = #tpu.pipeline_mode<synchronous>, transform_indices = @transform_8, window_bounds = array<i64: 1, 32>}, {transform_indices = @transform_9, window_bounds = array<i64: 2, 8, 32>}]} {
    %c0_i32 = arith.constant 0 : i32
    %0 = arith.cmpi eq, %arg1, %c0_i32 : i32
    %1 = arith.extui %0 : i1 to i32
    %c0_i32_0 = arith.constant 0 : i32
    %2 = arith.cmpi ne, %1, %c0_i32_0 : i32
    scf.if %2 {
      %c0_20 = arith.constant 0 : index
      %c0_21 = arith.constant 0 : index
      %c0_22 = arith.constant 0 : index
      %26 = vector.load %arg3[%c0_20, %c0_21, %c0_22] : memref<2x8x32xf32, #tpu.memory_space<vmem>>, vector<2x8x32xf32>
      %27 = vector.shape_cast %26 : vector<2x8x32xf32> to vector<16x32xf32>
      %c0_23 = arith.constant 0 : index
      %c0_24 = arith.constant 0 : index
      %c0_25 = arith.constant 0 : index
      %28 = vector.load %arg4[%c0_23, %c0_24, %c0_25] : memref<2x8x32xf32, #tpu.memory_space<vmem>>, vector<2x8x32xf32>
      %29 = vector.shape_cast %28 : vector<2x8x32xf32> to vector<16x32xf32>
      %c0_26 = arith.constant 0 : index
      %c0_27 = arith.constant 0 : index
      %30 = vector.load %arg7[%c0_26, %c0_27] : memref<32x32xf32, #tpu.memory_space<vmem>>, vector<32x32xf32>
      %cst_28 = arith.constant dense<0.000000e+00> : vector<16x32xf32>
      %31 = tpu.matmul %27, %30, %cst_28 {dimension_numbers = #tpu.dot_dimension_numbers<[1], [0], [0], [1], [0, 0, 1, 1], [], []>} : vector<16x32xf32>, vector<32x32xf32>, vector<16x32xf32> -> vector<16x32xf32>
      %c0_29 = arith.constant 0 : index
      %c0_30 = arith.constant 0 : index
      %32 = vector.load %arg8[%c0_29, %c0_30] : memref<1x32xf32, #tpu.memory_space<vmem>>, vector<1x32xf32>
      %33 = vector.broadcast %32 : vector<1x32xf32> to vector<16x32xf32>
      %34 = arith.addf %31, %33 : vector<16x32xf32>
      %c0_31 = arith.constant 0 : index
      %c0_32 = arith.constant 0 : index
      %35 = vector.load %arg9[%c0_31, %c0_32] : memref<32x32xf32, #tpu.memory_space<vmem>>, vector<32x32xf32>
      %cst_33 = arith.constant dense<0.000000e+00> : vector<16x32xf32>
      %36 = tpu.matmul %29, %35, %cst_33 {dimension_numbers = #tpu.dot_dimension_numbers<[1], [0], [0], [1], [0, 0, 1, 1], [], []>} : vector<16x32xf32>, vector<32x32xf32>, vector<16x32xf32> -> vector<16x32xf32>
      %c0_34 = arith.constant 0 : index
      %c0_35 = arith.constant 0 : index
      %37 = vector.load %arg10[%c0_34, %c0_35] : memref<1x32xf32, #tpu.memory_space<vmem>>, vector<1x32xf32>
      %38 = vector.broadcast %37 : vector<1x32xf32> to vector<16x32xf32>
      %39 = arith.addf %36, %38 : vector<16x32xf32>
      %40 = vector.shape_cast %34 : vector<16x32xf32> to vector<2x8x32xf32>
      %c0_36 = arith.constant 0 : index
      %c0_37 = arith.constant 0 : index
      %c0_38 = arith.constant 0 : index
      %41 = vector.load %arg12[%c0_36, %c0_37, %c0_38] : memref<2x8x32xf32, #tpu.memory_space<vmem>>, vector<2x8x32xf32>
      tpu.vector_store %arg12[%c0_36, %c0_37, %c0_38], %40 {strides = array<i32>} : memref<2x8x32xf32, #tpu.memory_space<vmem>>, vector<2x8x32xf32>,
      %42 = vector.shape_cast %39 : vector<16x32xf32> to vector<2x8x32xf32>
      %c0_39 = arith.constant 0 : index
      %c0_40 = arith.constant 0 : index
      %c0_41 = arith.constant 0 : index
      %43 = vector.load %arg13[%c0_39, %c0_40, %c0_41] : memref<2x8x32xf32, #tpu.memory_space<vmem>>, vector<2x8x32xf32>
      tpu.vector_store %arg13[%c0_39, %c0_40, %c0_41], %42 {strides = array<i32>} : memref<2x8x32xf32, #tpu.memory_space<vmem>>, vector<2x8x32xf32>,
    } else {
    }
    %c0 = arith.constant 0 : index
    %c0_1 = arith.constant 0 : index
    %c0_2 = arith.constant 0 : index
    %3 = vector.load %arg2[%c0, %c0_1, %c0_2] : memref<2x8x32xf32, #tpu.memory_space<vmem>>, vector<2x8x32xf32>
    %4 = vector.shape_cast %3 : vector<2x8x32xf32> to vector<16x32xf32>
    %c0_3 = arith.constant 0 : index
    %c0_4 = arith.constant 0 : index
    %5 = vector.load %arg5[%c0_3, %c0_4] : memref<32x32xf32, #tpu.memory_space<vmem>>, vector<32x32xf32>
    %cst = arith.constant dense<0.000000e+00> : vector<16x32xf32>
    %6 = tpu.matmul %4, %5, %cst {dimension_numbers = #tpu.dot_dimension_numbers<[1], [0], [0], [1], [0, 0, 1, 1], [], []>} : vector<16x32xf32>, vector<32x32xf32>, vector<16x32xf32> -> vector<16x32xf32>
    %c0_5 = arith.constant 0 : index
    %c0_6 = arith.constant 0 : index
    %7 = vector.load %arg6[%c0_5, %c0_6] : memref<1x32xf32, #tpu.memory_space<vmem>>, vector<1x32xf32>
    %8 = vector.broadcast %7 : vector<1x32xf32> to vector<16x32xf32>
    %9 = arith.addf %6, %8 : vector<16x32xf32>
    %10 = vector.shape_cast %9 : vector<16x32xf32> to vector<2x8x32xf32>
    %c0_7 = arith.constant 0 : index
    %c0_8 = arith.constant 0 : index
    %c0_9 = arith.constant 0 : index
    %11 = vector.load %arg12[%c0_7, %c0_8, %c0_9] : memref<2x8x32xf32, #tpu.memory_space<vmem>>, vector<2x8x32xf32>
    %cst_10 = arith.constant dense<0.000000e+00> : vector<2x8x8xf32>
    %12 = tpu.matmul %10, %11, %cst_10 {dimension_numbers = #tpu.dot_dimension_numbers<[2], [2], [1], [1], [0, 0, 0, 1, 1, 1], [0], [0]>} : vector<2x8x32xf32>, vector<2x8x32xf32>, vector<2x8x8xf32> -> vector<2x8x8xf32>
    %cst_11 = arith.constant dense<0xFF800000> : vector<2x8xf32>
    %13 = vector.multi_reduction <maximumf>, %12, %cst_11 [2] : vector<2x8x8xf32> to vector<2x8xf32>
    %14 = vector.shape_cast %13 : vector<2x8xf32> to vector<2x8x1xf32>
    %15 = vector.broadcast %14 : vector<2x8x1xf32> to vector<2x8x8xf32>
    %16 = arith.subf %12, %15 : vector<2x8x8xf32>
    %17 = math.exp %16 : vector<2x8x8xf32>
    %cst_12 = arith.constant dense<0.000000e+00> : vector<2x8xf32>
    %18 = vector.multi_reduction <add>, %17, %cst_12 [2] : vector<2x8x8xf32> to vector<2x8xf32>
    %19 = vector.shape_cast %18 : vector<2x8xf32> to vector<2x8x1xf32>
    %20 = tpu.reciprocal %19 : vector<2x8x1xf32> -> vector<2x8x1xf32>
    %21 = vector.broadcast %20 : vector<2x8x1xf32> to vector<2x8x8xf32>
    %22 = arith.mulf %17, %21 : vector<2x8x8xf32>
    %c0_13 = arith.constant 0 : index
    %c0_14 = arith.constant 0 : index
    %c0_15 = arith.constant 0 : index
    %23 = vector.load %arg13[%c0_13, %c0_14, %c0_15] : memref<2x8x32xf32, #tpu.memory_space<vmem>>, vector<2x8x32xf32>
    %cst_16 = arith.constant dense<0.000000e+00> : vector<2x8x32xf32>
    %24 = tpu.matmul %22, %23, %cst_16 {dimension_numbers = #tpu.dot_dimension_numbers<[2], [1], [1], [2], [0, 0, 0, 1, 1, 2], [0], [0]>} : vector<2x8x8xf32>, vector<2x8x32xf32>, vector<2x8x32xf32> -> vector<2x8x32xf32>
    %c0_17 = arith.constant 0 : index
    %c0_18 = arith.constant 0 : index
    %c0_19 = arith.constant 0 : index
    %25 = vector.load %arg11[%c0_17, %c0_18, %c0_19] : memref<2x8x32xf32, #tpu.memory_space<vmem>>, vector<2x8x32xf32>
    tpu.vector_store %arg11[%c0_17, %c0_18, %c0_19], %24 {strides = array<i32>} : memref<2x8x32xf32, #tpu.memory_space<vmem>>, vector<2x8x32xf32>,
    return
  }
  func.func @transform_0(%arg0: i32, %arg1: i32) -> (i32, i32, i32) {
    %c0_i32 = arith.constant 0 : i32
    %c0_i32_0 = arith.constant 0 : i32
    return %arg0, %arg1, %c0_i32 : i32, i32, i32
  }
  func.func @transform_1(%arg0: i32, %arg1: i32) -> (i32, i32, i32) {
    %c0_i32 = arith.constant 0 : i32
    %c0_i32_0 = arith.constant 0 : i32
    %c0_i32_1 = arith.constant 0 : i32
    return %arg0, %c0_i32, %c0_i32_0 : i32, i32, i32
  }
  func.func @transform_2(%arg0: i32, %arg1: i32) -> (i32, i32, i32) {
    %c0_i32 = arith.constant 0 : i32
    %c0_i32_0 = arith.constant 0 : i32
    %c0_i32_1 = arith.constant 0 : i32
    return %arg0, %c0_i32, %c0_i32_0 : i32, i32, i32
  }
  func.func @transform_3(%arg0: i32, %arg1: i32) -> (i32, i32) {
    %c0_i32 = arith.constant 0 : i32
    %c0_i32_0 = arith.constant 0 : i32
    %c0_i32_1 = arith.constant 0 : i32
    return %c0_i32, %c0_i32_0 : i32, i32
  }
  func.func @transform_4(%arg0: i32, %arg1: i32) -> (i32, i32) {
    %c0_i32 = arith.constant 0 : i32
    %c0_i32_0 = arith.constant 0 : i32
    %c0_i32_1 = arith.constant 0 : i32
    return %c0_i32, %c0_i32_0 : i32, i32
  }
  func.func @transform_5(%arg0: i32, %arg1: i32) -> (i32, i32) {
    %c0_i32 = arith.constant 0 : i32
    %c0_i32_0 = arith.constant 0 : i32
    %c0_i32_1 = arith.constant 0 : i32
    return %c0_i32, %c0_i32_0 : i32, i32
  }
  func.func @transform_6(%arg0: i32, %arg1: i32) -> (i32, i32) {
    %c0_i32 = arith.constant 0 : i32
    %c0_i32_0 = arith.constant 0 : i32
    %c0_i32_1 = arith.constant 0 : i32
    return %c0_i32, %c0_i32_0 : i32, i32
  }
  func.func @transform_7(%arg0: i32, %arg1: i32) -> (i32, i32) {
    %c0_i32 = arith.constant 0 : i32
    %c0_i32_0 = arith.constant 0 : i32
    %c0_i32_1 = arith.constant 0 : i32
    return %c0_i32, %c0_i32_0 : i32, i32
  }
  func.func @transform_8(%arg0: i32, %arg1: i32) -> (i32, i32) {
    %c0_i32 = arith.constant 0 : i32
    %c0_i32_0 = arith.constant 0 : i32
    %c0_i32_1 = arith.constant 0 : i32
    return %c0_i32, %c0_i32_0 : i32, i32
  }
  func.func @transform_9(%arg0: i32, %arg1: i32) -> (i32, i32, i32) {
    %c0_i32 = arith.constant 0 : i32
    %c0_i32_0 = arith.constant 0 : i32
    return %arg0, %arg1, %c0_i32 : i32, i32, i32
  }
}

</mosaic_0001>

<bundles_post_ra>
// kernel: tpu_custom_call.1
= control target key start
LH: loop header
LB: loop body
LE: loop exit
PB: predicated region body
PF: predicated region fallthrough
CT: control target
= control target key end

     0   :  { %14 = vsyncpa [#allocation5], 0  ;;  %s771_s0 = inlined_call_operand.hbm [shape: f32[2,8,32], index: 0, kind: input, shape index: {}]   ;;  %s772_s1 = inlined_call_operand.hbm [shape: f32[2,8,32], index: 1, kind: input, shape index: {}]   ;;  %s773_s2 = inlined_call_operand.hbm [shape: f32[2,8,32], index: 2, kind: input, shape index: {}]   ;;  %s774_s3 = inlined_call_operand.hbm [shape: f32[32,32], index: 3, kind: input, shape index: {}]   ;;  %s775_s4 = inlined_call_operand.vmem [shape: f32[1,32], index: 4, kind: input, shape index: {}]   ;;  %s776_s5 = inlined_call_operand.hbm [shape: f32[32,32], index: 5, kind: input, shape index: {}]   ;;  %s777_s6 = inlined_call_operand.vmem [shape: f32[1,32], index: 6, kind: input, shape index: {}]   ;;  %s778_s7 = inlined_call_operand.hbm [shape: f32[32,32], index: 7, kind: input, shape index: {}]   ;;  %s779_s8 = inlined_call_operand.vmem [shape: f32[1,32], index: 8, kind: input, shape index: {}]   ;;  %s780_s9 = inlined_call_operand.hbm [shape: f32[2,8,32], index: 9, kind: output, shape index: {}]  }
   0x1   :  { %15 = vsyncpa [#allocation8], 0 }
   0x2   :  { %16 = vsyncpa [#allocation11], 0 }
   0x3   :  { %17 = vsyncpa [#allocation14], 0 }
   0x4   :  { %18 = vsyncpa [#allocation6], 0  ;;  %s36_s11 = sshll.u32 %s772_s1, 4  ;;  %s639_s12 = smov [#allocation7]   ;;  %s37_s11 = int_to_ptr.hbm [resolvable:$true] %s36_s11 }
   0x5   :  { %s38_s13 = sshll.u32 %s639_s12, 4  ;;  %s62_s16 = sshll.u32 %s774_s3, 4  ;;  %s39_s13 = int_to_ptr.vmem [resolvable:$true] %s38_s13  ;;  %s63_s16 = int_to_ptr.hbm [resolvable:$true] %s62_s16 }
   0x6   :  { %s640_s17 = smov 128   ;;  %s641_s18 = smov 8  }
   0x7   :  { %44 = dma.hbm_to_vmem [thread:$0]  %s37_s11, 256, %s39_s13, [#allocation8], %s640_s17, %s640_s17, %s641_s18  }
   0x8   :  { %s642_s19 = smov [#allocation10]   ;;  %s23_s1 = sshll.u32 %s771_s0, 4  ;;  %s24_s1 = int_to_ptr.hbm [resolvable:$true] %s23_s1 }
   0x9   :  { %s64_s20 = sshll.u32 %s642_s19, 4  ;;  %s49_s24 = sshll.u32 %s773_s2, 4  ;;  %s65_s20 = int_to_ptr.vmem [resolvable:$true] %s64_s20  ;;  %s50_s24 = int_to_ptr.hbm [resolvable:$true] %s49_s24 }
   0xa   :  { %70 = dma.hbm_to_vmem [thread:$0]  %s63_s16, 512, %s65_s20, [#allocation11], %s640_s17, %s640_s17, %s641_s18  }
   0xb   :  { %s643_s25 = smov [#allocation4]   ;;  %s644_s27 = smov [#allocation9]  }
   0xc   :  { %s25_s26 = sshll.u32 %s643_s25, 4  ;;  %s51_s0 = sshll.u32 %s644_s27, 4  ;;  %s26_s26 = int_to_ptr.vmem [resolvable:$true] %s25_s26  ;;  %s52_s0 = int_to_ptr.vmem [resolvable:$true] %s51_s0 }
   0xd   :  { %31 = dma.hbm_to_vmem [thread:$0]  %s24_s1, 256, %s26_s26, [#allocation5], %s640_s17, %s640_s17, %s641_s18  }
   0xe   :  { %s77_s30 = sshll.u32 %s776_s5, 4  ;;  %s92_s11 = sshll.u32 %s778_s7, 4  ;;  %s78_s30 = int_to_ptr.hbm [resolvable:$true] %s77_s30  ;;  %s93_s11 = int_to_ptr.hbm [resolvable:$true] %s92_s11 }
   0xf   :  { %57 = dma.hbm_to_vmem [thread:$0]  %s50_s24, 256, %s52_s0, [#allocation8], %s640_s17, %s640_s17, %s641_s18  }
  0x10   :  { %s645_s12 = smov [#allocation12]   ;;  %s646_s14 = smov [#allocation13]  }
  0x11   :  { %s79_s13 = sshll.u32 %s645_s12, 4  ;;  %s94_s5 = sshll.u32 %s646_s14, 4  ;;  %s80_s13 = int_to_ptr.vmem [resolvable:$true] %s79_s13  ;;  %s95_s5 = int_to_ptr.vmem [resolvable:$true] %s94_s5 }
  0x12   :  { %85 = dma.hbm_to_vmem [thread:$0]  %s78_s30, 512, %s80_s13, [#allocation11], %s640_s17, %s640_s17, %s641_s18  }
  0x13   :  { %100 = dma.hbm_to_vmem [thread:$0]  %s93_s11, 512, %s95_s5, [#allocation14], %s640_s17, %s640_s17, %s641_s18  }
  0x14   :  { %629 = dma.done.wait [#allocation5], 256  }
  0x15   :  { %630 = vsyncadd [#allocation5], 4294967040 }
  0x16   :  { %631 = dma.done.wait [#allocation8], 512  }
  0x17   :  { %632 = vsyncadd [#allocation8], 4294966784 }
  0x18   :  { %633 = dma.done.wait [#allocation11], 1024  }
  0x19   :  { %634 = vsyncadd [#allocation11], 4294966272 }
  0x1a   :  { %635 = dma.done.wait [#allocation14], 512  }
  0x1b   :  { %636 = vsyncadd [#allocation14], 4294966784  ;;  %v138_v0 = vld [vmem:[#allocation12 + $0x18] sm:$0xff]  ;;  %v137_v1 = vld [vmem:[#allocation12 + $0x10] sm:$0xff]  ;;  %vm143_vm0 = vcmask 261120   ;;  %vm308_vm1 = vcmask 64512  }
  0x1c   :  { %162 = vmatpush.msra.mxu0 %v138_v0  ;;  %v219_v2 = vld [vmem:[#allocation10 + $0x18] sm:$0xff]  ;;  %v136_v3 = vld [vmem:[#allocation12 + $0x8] sm:$0xff]  ;;  %v218_v4 = vld [vmem:[#allocation10 + $0x10] sm:$0xff]  ;;  %s413_s1 = sshll.u32 %s780_s9, 4  ;;  %s414_s1 = int_to_ptr.hbm [resolvable:$true] %s413_s1 }
  0x1d   :  { %243 = vmatpush.msra.mxu2 %v219_v2  ;;  %v217_v5 = vld [vmem:[#allocation10 + $0x8] sm:$0xff]  ;;  %v135_v6 = vld [vmem:[#allocation12] sm:$0xff]  ;;  %v214_v9 = vld [vmem:[#allocation4] sm:$0xff] }
  0x1e   :  { %163 = vmatpush.msra.mxu0 %v137_v1  ;;  %v131_v7 = vld [vmem:[#allocation7] sm:$0xff]  ;;  %v132_v10 = vld [vmem:[#allocation7 + $0x8] sm:$0xff]  ;;  %v215_v11 = vld [vmem:[#allocation4 + $0x8] sm:$0xff] }
  0x1f   :  { %244 = vmatpush.msra.mxu2 %v218_v4  ;;  %v216_v8 = vld [vmem:[#allocation10] sm:$0xff]  ;;  %v450_v12 = vld [vmem:[%s777_s6] ss:$0 sm:$0xff]  ;;  %v176_v24 = vld [vmem:[#allocation13 + $0x18] sm:$0xff] }
  0x20   :  { %164 = vmatpush.msra.mxu0 %v136_v3  ;;  %v451_v15 = vld [vmem:[%s775_s4] ss:$0 sm:$0xff]  ;;  %199 = vmatpush.msra.mxu1 %v176_v24  ;;  %v174_v26 = vld [vmem:[#allocation13 + $0x8] sm:$0xff]  ;;  %v173_v27 = vld [vmem:[#allocation13] sm:$0xff] }
  0x21   :  { %245 = vmatpush.msra.mxu2 %v217_v5  ;;  %v175_v25 = vld [vmem:[#allocation13 + $0x10] sm:$0xff]  ;;  %v134_v33 = vld [vmem:[#allocation9 + $0x8] sm:$0xff] }
  0x22   :  { %165 = vmatpush.msra.mxu0 %v135_v6  ;;  %200 = vmatpush.msra.mxu1 %v175_v25  ;;  %v133_v32 = vld [vmem:[#allocation9] sm:$0xff] }
  0x23   :  { %429 = vmatmul.msk.f32.vlgmr.msra.gmra.mxu0 %vm143_vm0, %v131_v7  ;;  %246 = vmatpush.msra.mxu2 %v216_v8  ;;  %v452_v44 = vld [vmem:[%s779_s8] ss:$0 sm:$0xff]  ;;  %s647_s8 = smov [#allocation15]  }
  0x24   :  { %433 = vmatmul.msk.f32.vlgmr.msra.gmra.mxu2 %vm143_vm0, %v214_v9  ;;  %201 = vmatpush.msra.mxu1 %v174_v26  ;;  %s411_s20 = sshll.u32 %s647_s8, 4  ;;  %s412_s20 = int_to_ptr.vmem [resolvable:$true] %s411_s20 }
  0x26   :  { %202 = vmatpush.msra.mxu1 %v173_v27 }
  0x27   :  { %431 = vmatmul.msk.f32.vlgmr.msra.gmra.mxu1 %vm143_vm0, %v133_v32 }
  0x2b   :  { %430 = vmatmul.msk.f32.gmra.mxu0 %vm143_vm0, %v132_v10 }
  0x2c   :  { %434 = vmatmul.msk.f32.gmra.mxu2 %vm143_vm0, %v215_v11 }
  0x2f   :  { %432 = vmatmul.msk.f32.gmra.mxu1 %vm143_vm0, %v134_v33 }
  0xa0   :  { %v167_v13 = vpop.f32.mrf.mxu0 }
  0xa1   :  { %v168_v14 = vadd.f32 %v450_v12, %v167_v13 }
  0xa3   :  { %210 = vst.msk [vmem:[#allocation2] sm:$0xff] %vm143_vm0, %v168_v14 }
  0xa4   :  { %v204_v45 = vpop.f32.mrf.mxu1 }
  0xa5   :  { %v205_v46 = vadd.f32 %v452_v44, %v204_v45 }
  0xa7   :  { %v248_v16 = vpop.f32.mrf.mxu2  ;;  %212 = vst.msk [vmem:[#allocation3] sm:$0xff] %vm143_vm0, %v205_v46 }
  0xa8   :  { %v170_v17 = vpop.f32.mrf.mxu0  ;;  %v249_v19 = vadd.f32 %v451_v15, %v248_v16 }
  0xa9   :  { %v171_v18 = vadd.f32 %v450_v12, %v170_v17 }
  0xaa   :  { %v254_v20 = vld [vmem:[#allocation2] sm:$0xff] }
  0xab   :  { %211 = vst.msk [vmem:[#allocation2 + $0x8] sm:$0xff] %vm143_vm0, %v171_v18  ;;  %435 = vmatpush.xpose.msk.msra.mxu3 %vm143_vm0, %v254_v20 }
  0xac   :  { %v207_v47 = vpop.f32.mrf.mxu1 }
  0xad   :  { %v208_v48 = vadd.f32 %v452_v44, %v207_v47 }
  0xae   :  { %436 = vmatmul.msk.f32.vlgmr.msra.gmra.mxu3 %vm143_vm0, %v249_v19  ;;  %v357_v49 = vld [vmem:[#allocation3] sm:$0xff] }
  0xaf   :  { %v251_v21 = vpop.f32.mrf.mxu2  ;;  %213 = vst.msk [vmem:[#allocation3 + $0x8] sm:$0xff] %vm143_vm0, %v208_v48 }
  0xb0   :  { %v252_v22 = vadd.f32 %v451_v15, %v251_v21 }
  0xb2   :  { %v255_v23 = vld [vmem:[#allocation2 + $0x8] sm:$0xff] }
  0xb3   :  { %437 = vmatpush.xpose.msk.msrb.mxu3 %vm143_vm0, %v255_v23 }
  0xb6   :  { %438 = vmatmul.msk.f32.vlgmr.msrb.gmra.mxu3 %vm143_vm0, %v252_v22  ;;  %v358_v50 = vld [vmem:[#allocation3 + $0x8] sm:$0xff] }
  0xb7   :  { %377 = vmatpush.msra.mxu3 %v357_v49  ;;  %400 = vmatpush.msrb.mxu0 %v358_v50 }
 0x131   :  { %v279_v28 = vpop.f32.mrf.mxu3 }
 0x132   :  { %v309_v29 = vsel %vm308_vm1, %v279_v28, -inf }
 0x133   :  { %310 = vmax.xlane.f32.xlu0 %v309_v29 }
 0x139   :  { %v305_v30 = vpop.f32.mrf.mxu3 }
 0x13a   :  { %v312_v31 = vsel %vm308_vm1, %v305_v30, -inf }
 0x13b   :  { %313 = vmax.xlane.f32.xlu0 %v312_v31 }
 0x1a6   :  { %v311_v34 = vpop.xlane.xlu0 %310 }
 0x1a7   :  { %v315_v35 = vsub.f32 %v279_v28, %v311_v34 }
 0x1a9   :  { %v317_v36 = vmul.f32 1.442695, %v315_v35 }
 0x1ab   :  { %453 = vpow2.f32 %v317_v36 }
 0x1ae   :  { %v314_v37 = vpop.xlane.xlu0 %313 }
 0x1af   :  { %v316_v38 = vsub.f32 %v305_v30, %v314_v37 }
 0x1b1   :  { %v454_v39 = vpop.eup %453  ;;  %v319_v40 = vmul.f32 1.442695, %v316_v38 }
 0x1b2   :  { %v321_v41 = vsel %vm308_vm1, %v454_v39, 0.0 }
 0x1b3   :  { %455 = vpow2.f32 %v319_v40  ;;  %322 = vadd.xlane.f32.xlu1 %v321_v41 }
 0x1b9   :  { %v456_v42 = vpop.eup %455 }
 0x1ba   :  { %v324_v43 = vsel %vm308_vm1, %v456_v42, 0.0 }
 0x1bb   :  { %325 = vadd.xlane.f32.xlu1 %v324_v43 }
 0x226   :  { %v323_v51 = vpop.xlane.xlu1 %322 }
 0x227   :  { %457 = vrcp.f32 %v323_v51  ;;  %v338_v56 = vand.u32 2147483648, %v323_v51  ;;  %v336_v58 = vand.u32 2147483647, %v323_v51  ;;  %vm332_vm3 = vweird.f32 %v323_v51 }
 0x229   :  { %v339_v61 = vor.u32 1.1754944e-38, %v338_v56  ;;  %vm337_vm5 = vcmp.eq.f32.partialorder %v336_v58, 8.507059e+37 }
 0x22d   :  { %v458_v52 = vpop.eup %457 }
 0x22e   :  { %v328_v53 = vmul.f32 %v458_v52, %v323_v51  ;;  %v326_v54 = vpop.xlane.xlu1 %325  ;;  %vm333_vm2 = vweird.f32 %v458_v52 }
 0x22f   :  { %459 = vrcp.f32 %v326_v54  ;;  %vm334_vm4 = vmor %vm332_vm3, %vm333_vm2  ;;  %v352_v3 = vand.u32 2147483648, %v326_v54  ;;  %v350_v5 = vand.u32 2147483647, %v326_v54  ;;  %vm346_vm7 = vweird.f32 %v326_v54 }
 0x230   :  { %v329_v55 = vsub.f32 1.0, %v328_v53 }
 0x231   :  { %v353_v7 = vor.u32 1.1754944e-38, %v352_v3  ;;  %vm351_vm9 = vcmp.eq.f32.partialorder %v350_v5, 8.507059e+37 }
 0x232   :  { %v330_v57 = vmul.f32 %v458_v52, %v329_v55 }
 0x234   :  { %v331_v59 = vadd.f32 %v458_v52, %v330_v57 }
 0x235   :  { %v460_v60 = vpop.eup %459 }
 0x236   :  { %v335_v62 = vsel %vm334_vm4, %v458_v52, %v331_v59  ;;  %v342_v63 = vmul.f32 %v460_v60, %v326_v54  ;;  %vm347_vm6 = vweird.f32 %v460_v60 }
 0x237   :  { %v340_v0 = vsel %vm337_vm5, %v339_v61, %v335_v62  ;;  %vm348_vm8 = vmor %vm346_vm7, %vm347_vm6 }
 0x238   :  { %v343_v1 = vsub.f32 1.0, %v342_v63  ;;  %v355_v2 = vmul.f32 %v454_v39, %v340_v0 }
 0x23a   :  { %v344_v4 = vmul.f32 %v460_v60, %v343_v1  ;;  %439 = vmatmul.msk.f32.vlgmr.msra.gmra.mxu3 %vm308_vm1, %v355_v2 }
 0x23c   :  { %v345_v6 = vadd.f32 %v460_v60, %v344_v4 }
 0x23e   :  { %v349_v8 = vsel %vm348_vm8, %v460_v60, %v345_v6 }
 0x23f   :  { %v354_v9 = vsel %vm351_vm9, %v353_v7, %v349_v8 }
 0x240   :  { %v356_v10 = vmul.f32 %v456_v42, %v354_v9 }
 0x242   :  { %440 = vmatmul.msk.f32.vlgmr.msrb.gmra.mxu0 %vm308_vm1, %v356_v10 }
 0x2bd   :  { %v379_v11 = vpop.f32.mrf.mxu3 }
 0x2be   :  { %405 = vst.msk [vmem:[#allocation15] sm:$0xff] %vm143_vm0, %v379_v11 }
 0x2bf   :  { %v402_v12 = vpop.f32.mrf.mxu0 }
 0x2c0   :  { %406 = vst.msk [vmem:[#allocation15 + $0x8] sm:$0xff] %vm143_vm0, %v402_v12 }
 0x2c1   :  { %419 = dma.vmem_to_hbm [thread:$0]  %s412_s20, 256, %s414_s1, [#allocation6], %s640_s17, %s640_s17, %s641_s18  }
 0x2c2   :  { %637 = dma.done.wait [#allocation6], 256  }
 0x2c3   :  { %638 = vsyncadd [#allocation6], 4294967040 }
 0x2c4   :  { %424 = vsyncpa [#allocation5], 1 }
 0x2c5   :  { %425 = vsyncpa [#allocation8], 1 }
 0x2c6   :  { %426 = vsyncpa [#allocation11], 1 }
 0x2c7   :  { %427 = vsyncpa [#allocation14], 1 }
 0x2c8   :  { %428 = vsyncpa [#allocation6], 1 }

</bundles_post_ra>
